<compile_context>
chip_gen: v6e
topology: v6e:2x2x1
jax: 0.10.0
libtpu: 0.0.40
codegen_flags: <defaults>
</compile_context>

<pallas_src>
import jax
import jax.numpy as jnp
from jax import lax
from jax.experimental import pallas as pl
from jax.experimental.pallas import tpu as pltpu

SIGMA_DATA = 0.5


def _edm_precond_kernel(wp2_ref, possig_ref, onehot_ref, meanproj_ref,
                        dpos_ref, seg_ref):
    phase = pl.program_id(0)
    tile = pl.program_id(1)

    sig = possig_ref[3:4, :]                          # (1, TN)  sigma on lanes
    c_noise = jnp.log(sig) * jnp.float32(0.25)        # (1, TN)

    # Linear model stand-in, folded:  diff[f, :] = w0[f] + c_noise * w1[f]
    # (w0 = sum(wp[:F], 0), w1 = wp[F]; 6 scalars read from SMEM).
    diff = jnp.concatenate(
        [wp2_ref[0] + c_noise * wp2_ref[3],
         wp2_ref[1] + c_noise * wp2_ref[4],
         wp2_ref[2] + c_noise * wp2_ref[5]], axis=0)  # (3, TN)

    @pl.when((phase == 0) & (tile == 0))
    def _():
        seg_ref[...] = jnp.zeros_like(seg_ref)

    @pl.when(phase == 0)
    def _():
        # Per-graph segment sum of diff: (3, TN) @ (TN, B) -> (3, B).
        seg_ref[...] += jnp.dot(diff, onehot_ref[...],
                                preferred_element_type=jnp.float32)

    @pl.when(phase == 1)
    def _():
        pos = possig_ref[0:3, :]                      # (3, TN)
        sd2 = jnp.float32(SIGMA_DATA * SIGMA_DATA)
        r = lax.rsqrt(sig * sig + sd2)                # one rsqrt feeds all c_*
        c_in = r
        c_out = sig * jnp.float32(SIGMA_DATA) * r
        c_skip = sd2 * (r * r)
        pos_in = c_in * pos

        # Broadcast per-graph means back to nodes: (3, B) @ (B, TN) -> (3, TN)
        # (large N stays on the MXU lane axis).
        node_mean = jnp.dot(seg_ref[...], meanproj_ref[...],
                            preferred_element_type=jnp.float32)
        f_pos = pos_in + (diff - node_mean)
        dpos_ref[...] = c_skip * pos + c_out * f_pos  # lane-dense store


def edm_precond_forward(x, pos, edge_index, batch, sigma, wp, num_graphs,
                        *, tile_n=128):
    """JAX wrapper: static packing / padding + one pallas_call."""
    del edge_index  # the linear stand-in model does not use edges
    n, f = x.shape

    # sigma handling: scalar or per-node (PyTorch broadcasting semantics);
    # per-graph (B,) accepted as a convenience when B != N (unambiguous).
    sigma = jnp.asarray(sigma, jnp.float32).reshape(-1)
    if sigma.shape[0] == 1:
        sigma = jnp.broadcast_to(sigma, (n,))
    elif sigma.shape[0] == num_graphs and num_graphs != n:
        sigma = sigma[batch]
    sigma = sigma.astype(jnp.float32)

    # Pad node axis to a lane-dense multiple of 128.
    n_pad = ((n + tile_n - 1) // tile_n) * tile_n
    pad = n_pad - n
    num_tiles = n_pad // tile_n

    # Feature-major packed operand: rows = [pos_x, pos_y, pos_z, sigma].
    # Padded sigma = 1.0 so log/rsqrt stay finite (0 * -inf would NaN the MXU).
    pos_fm = jnp.pad(pos.astype(jnp.float32).T, ((0, 0), (0, pad)))      # (3, n_pad)
    sig_fm = jnp.pad(sigma[None, :], ((0, 0), (0, pad)), constant_values=1.0)
    possig = jnp.concatenate([pos_fm, sig_fm], axis=0)                   # (4, n_pad)

    # Segment-mean operands, O(N*B): padded nodes get an all-zero onehot row.
    # (Kept in f32; after removing the N^2 operand this stream is tiny. A bf16
    #  onehot halves it again if B ever gets large.)
    batch_pad = jnp.pad(batch.astype(jnp.int32), (0, pad), constant_values=-1)
    onehot = jax.nn.one_hot(batch_pad, num_graphs, dtype=jnp.float32)    # (n_pad, B)
    counts = jnp.sum(onehot, axis=0)
    counts = jnp.where(counts == 0.0, jnp.float32(1.0), counts)
    meanproj = (onehot / counts).T                                       # (B, n_pad)

    # Fold x_in = [ones_F | c_noise] through wp:
    #   x_in @ wp = sum(wp[:F], 0) + c_noise * wp[F]   -> 6 scalars, SMEM.
    wp = wp.astype(jnp.float32)
    wp2_flat = jnp.concatenate([jnp.sum(wp[:f], axis=0), wp[f]])         # (6,)

    cost = pl.CostEstimate(
        flops=int(12 * n_pad * num_graphs + 32 * n_pad),
        transcendentals=int(2 * n_pad),
        bytes_accessed=int(4 * (possig.size + onehot.size + meanproj.size
                                + 6 + 3 * n_pad)),
    )

    dpos_fm = pl.pallas_call(
        _edm_precond_kernel,
        grid=(2, num_tiles),                     # (phase, node tile)
        out_shape=jax.ShapeDtypeStruct((3, n_pad), jnp.float32),
        in_specs=[
            # folded model weights: 6 scalars in SMEM (no VMEM tile / DMA)
            pl.BlockSpec(memory_space=pltpu.MemorySpace.SMEM),
            # packed pos+sigma, needed in both phases
            pl.BlockSpec((4, tile_n), lambda p, t: (0, t)),
            # onehot only needed in phase 0 -> pinned during phase 1
            pl.BlockSpec((tile_n, num_graphs), lambda p, t: (t * (1 - p), 0)),
            # meanproj only needed in phase 1 -> pinned during phase 0
            pl.BlockSpec((num_graphs, tile_n), lambda p, t: (0, t * p)),
        ],
        # output pinned to block 0 during phase 0 -> single writeback per tile
        out_specs=pl.BlockSpec((3, tile_n), lambda p, t: (0, t * p)),
        scratch_shapes=[pltpu.VMEM((3, num_graphs), jnp.float32)],
        compiler_params=pltpu.CompilerParams(
            dimension_semantics=("arbitrary", "arbitrary")),
        cost_estimate=cost,
    )(wp2_flat, possig, onehot, meanproj)

    d_pos = dpos_fm[:, :n].T                    # back to node-major (n, 3)

    # D_x = ones_like(x): constant -> emitted in the wrapper, not the kernel.
    d_x = jnp.ones((n, f), x.dtype)
    return d_x, d_pos


def _reference(x, pos, batch, sigma, wp, num_graphs):
    """Pure-JAX reference mirroring the PyTorch forward (EGNN branch)."""
    n, f = x.shape
    sig = jnp.asarray(sigma, jnp.float32).reshape(-1, 1)
    sd2 = SIGMA_DATA ** 2
    c_skip = sd2 / (sig ** 2 + sd2)
    c_out = sig * SIGMA_DATA / jnp.sqrt(sig ** 2 + sd2)
    c_in = 1.0 / jnp.sqrt(sd2 + sig ** 2)
    c_noise = jnp.log(sig) / 4.0
    pos_in = c_in * pos
    x_in = jnp.concatenate([jnp.ones((n, f), jnp.float32),
                            jnp.broadcast_to(c_noise, (n, 1))], axis=-1)
    fpos_model = pos_in + x_in @ wp            # linear stand-in for EGNN
    diff = fpos_model - pos_in
    seg_sum = jax.ops.segment_sum(diff, batch, num_graphs)
    cnt = jax.ops.segment_sum(jnp.ones((n,), jnp.float32), batch, num_graphs)
    cnt = jnp.where(cnt == 0, 1.0, cnt)[:, None]
    means = seg_sum / cnt
    f_pos = pos_in + (diff - means[batch])
    d_pos = c_skip * pos + c_out * f_pos
    return jnp.ones((n, f), x.dtype), d_pos


if __name__ == "__main__":
    key = jax.random.PRNGKey(0)
    k_x, k_pos, k_sig, k_wp = jax.random.split(key, 4)

    N, F, B = 16, 4, 2            # 16 nodes, 4 features, 2 graphs
    x = jax.random.normal(k_x, (N, F), jnp.float32)
    pos = jax.random.normal(k_pos, (N, 3), jnp.float32)
    batch = jnp.repeat(jnp.arange(B, dtype=jnp.int32), N // B)               # (N,)
    edge_index = jnp.stack([jnp.arange(N, dtype=jnp.int32),
                            jnp.roll(jnp.arange(N, dtype=jnp.int32), 1)])    # (2, N)
    sigma = jnp.exp(jax.random.normal(k_sig, (N,), jnp.float32) * 0.5)       # per-node sigma > 0

    # Deterministic synthetic model weights (linear stand-in for EGNN).
    wp = jax.random.normal(k_wp, (F + 1, 3), jnp.float32) * 0.1

    d_x, d_pos = edm_precond_forward(x, pos, edge_index, batch, sigma, wp, B)
    jax.block_until_ready((d_x, d_pos))

    ref_dx, ref_dpos = _reference(x, pos, batch, sigma, wp, B)
    assert d_x.shape == (N, F) and d_pos.shape == (N, 3)
    assert jnp.allclose(d_x, ref_dx, atol=1e-5, rtol=1e-5)
    assert jnp.allclose(d_pos, ref_dpos, atol=1e-4, rtol=1e-4)

    print("KERNEL_OK")
</pallas_src>

<mosaic_0001>
module attributes {stable_mosaic.version = 11 : i64} {
  func.func @_edm_precond_kernel(%arg0: i32, %arg1: i32, %arg2: memref<6xf32, #tpu.memory_space<smem>>, %arg3: memref<4x128xf32, #tpu.memory_space<vmem>>, %arg4: memref<128x2xf32, #tpu.memory_space<vmem>>, %arg5: memref<2x128xf32, #tpu.memory_space<vmem>>, %arg6: memref<3x128xf32, #tpu.memory_space<vmem>>, %arg7: memref<3x2xf32, #tpu.memory_space<vmem>>) attributes {dimension_semantics = [#tpu.dimension_semantics<arbitrary>, #tpu.dimension_semantics<arbitrary>], iteration_bounds = array<i64: 2, 1>, scalar_prefetch = 0 : i64, scratch_operands = 1 : i64, tpu.core_type = #tpu.core_type<tc>, window_params = [{transform_indices = @transform_0, window_bounds = array<i64: 6>}, {transform_indices = @transform_1, window_bounds = array<i64: 4, 128>}, {transform_indices = @transform_2, window_bounds = array<i64: 128, 2>}, {transform_indices = @transform_3, window_bounds = array<i64: 2, 128>}, {transform_indices = @transform_4, window_bounds = array<i64: 3, 128>}]} {
    %c3 = arith.constant 3 : index
    %c0 = arith.constant 0 : index
    %0 = vector.load %arg3[%c3, %c0] : memref<4x128xf32, #tpu.memory_space<vmem>>, vector<1x128xf32>
    %1 = math.log %0 : vector<1x128xf32>
    %cst = arith.constant 2.500000e-01 : f32
    %2 = vector.broadcast %cst : f32 to vector<1x128xf32>
    %3 = arith.mulf %1, %2 : vector<1x128xf32>
    %c0_0 = arith.constant 0 : index
    %4 = memref.load %arg2[%c0_0] : memref<6xf32, #tpu.memory_space<smem>>
    %c3_1 = arith.constant 3 : index
    %5 = memref.load %arg2[%c3_1] : memref<6xf32, #tpu.memory_space<smem>>
    %6 = vector.broadcast %5 : f32 to vector<1x128xf32>
    %7 = arith.mulf %3, %6 : vector<1x128xf32>
    %8 = vector.broadcast %4 : f32 to vector<1x128xf32>
    %9 = arith.addf %8, %7 : vector<1x128xf32>
    %c1 = arith.constant 1 : index
    %10 = memref.load %arg2[%c1] : memref<6xf32, #tpu.memory_space<smem>>
    %c4 = arith.constant 4 : index
    %11 = memref.load %arg2[%c4] : memref<6xf32, #tpu.memory_space<smem>>
    %12 = vector.broadcast %11 : f32 to vector<1x128xf32>
    %13 = arith.mulf %3, %12 : vector<1x128xf32>
    %14 = vector.broadcast %10 : f32 to vector<1x128xf32>
    %15 = arith.addf %14, %13 : vector<1x128xf32>
    %c2 = arith.constant 2 : index
    %16 = memref.load %arg2[%c2] : memref<6xf32, #tpu.memory_space<smem>>
    %c5 = arith.constant 5 : index
    %17 = memref.load %arg2[%c5] : memref<6xf32, #tpu.memory_space<smem>>
    %18 = vector.broadcast %17 : f32 to vector<1x128xf32>
    %19 = arith.mulf %3, %18 : vector<1x128xf32>
    %20 = vector.broadcast %16 : f32 to vector<1x128xf32>
    %21 = arith.addf %20, %19 : vector<1x128xf32>
    %22 = tpu.concatenate %9, %15, %21 in 0 : vector<1x128xf32>, vector<1x128xf32>, vector<1x128xf32> -> vector<3x128xf32>
    %c0_i32 = arith.constant 0 : i32
    %23 = arith.cmpi eq, %arg0, %c0_i32 : i32
    %c0_i32_2 = arith.constant 0 : i32
    %24 = arith.cmpi eq, %arg1, %c0_i32_2 : i32
    %25 = arith.andi %23, %24 : i1
    %26 = arith.extui %25 : i1 to i32
    %c0_i32_3 = arith.constant 0 : i32
    %27 = arith.cmpi ne, %26, %c0_i32_3 : i32
    scf.if %27 {
      %cst_7 = arith.constant 0.000000e+00 : f32
      %34 = vector.broadcast %cst_7 : f32 to vector<3x2xf32>
      %c0_8 = arith.constant 0 : index
      %c0_9 = arith.constant 0 : index
      %35 = vector.load %arg7[%c0_8, %c0_9] : memref<3x2xf32, #tpu.memory_space<vmem>>, vector<3x2xf32>
      tpu.vector_store %arg7[%c0_8, %c0_9], %34 {strides = array<i32>} : memref<3x2xf32, #tpu.memory_space<vmem>>, vector<3x2xf32>,
    } else {
    }
    %c0_i32_4 = arith.constant 0 : i32
    %28 = arith.cmpi eq, %arg0, %c0_i32_4 : i32
    %29 = arith.extui %28 : i1 to i32
    %c0_i32_5 = arith.constant 0 : i32
    %30 = arith.cmpi ne, %29, %c0_i32_5 : i32
    scf.if %30 {
      %c0_7 = arith.constant 0 : index
      %c0_8 = arith.constant 0 : index
      %34 = vector.load %arg7[%c0_7, %c0_8] : memref<3x2xf32, #tpu.memory_space<vmem>>, vector<3x2xf32>
      %c0_9 = arith.constant 0 : index
      %c0_10 = arith.constant 0 : index
      %35 = vector.load %arg4[%c0_9, %c0_10] : memref<128x2xf32, #tpu.memory_space<vmem>>, vector<128x2xf32>
      %cst_11 = arith.constant dense<0.000000e+00> : vector<3x2xf32>
      %36 = tpu.matmul %22, %35, %cst_11 {dimension_numbers = #tpu.dot_dimension_numbers<[1], [0], [0], [1], [0, 0, 1, 1], [], []>} : vector<3x128xf32>, vector<128x2xf32>, vector<3x2xf32> -> vector<3x2xf32>
      %37 = arith.addf %34, %36 : vector<3x2xf32>
      %c0_12 = arith.constant 0 : index
      %c0_13 = arith.constant 0 : index
      %38 = vector.load %arg7[%c0_12, %c0_13] : memref<3x2xf32, #tpu.memory_space<vmem>>, vector<3x2xf32>
      tpu.vector_store %arg7[%c0_12, %c0_13], %37 {strides = array<i32>} : memref<3x2xf32, #tpu.memory_space<vmem>>, vector<3x2xf32>,
    } else {
    }
    %c1_i32 = arith.constant 1 : i32
    %31 = arith.cmpi eq, %arg0, %c1_i32 : i32
    %32 = arith.extui %31 : i1 to i32
    %c0_i32_6 = arith.constant 0 : i32
    %33 = arith.cmpi ne, %32, %c0_i32_6 : i32
    scf.if %33 {
      %c0_7 = arith.constant 0 : index
      %c0_8 = arith.constant 0 : index
      %34 = vector.load %arg3[%c0_7, %c0_8] : memref<4x128xf32, #tpu.memory_space<vmem>>, vector<3x128xf32>
      %35 = arith.mulf %0, %0 : vector<1x128xf32>
      %cst_9 = arith.constant 2.500000e-01 : f32
      %36 = vector.broadcast %cst_9 : f32 to vector<1x128xf32>
      %37 = arith.addf %35, %36 : vector<1x128xf32>
      %38 = math.rsqrt %37 : vector<1x128xf32>
      %cst_10 = arith.constant 5.000000e-01 : f32
      %39 = vector.broadcast %cst_10 : f32 to vector<1x128xf32>
      %40 = arith.mulf %0, %39 : vector<1x128xf32>
      %41 = arith.mulf %40, %38 : vector<1x128xf32>
      %42 = arith.mulf %38, %38 : vector<1x128xf32>
      %cst_11 = arith.constant 2.500000e-01 : f32
      %43 = vector.broadcast %cst_11 : f32 to vector<1x128xf32>
      %44 = arith.mulf %43, %42 : vector<1x128xf32>
      %45 = vector.broadcast %38 : vector<1x128xf32> to vector<3x128xf32>
      %46 = arith.mulf %45, %34 : vector<3x128xf32>
      %c0_12 = arith.constant 0 : index
      %c0_13 = arith.constant 0 : index
      %47 = vector.load %arg7[%c0_12, %c0_13] : memref<3x2xf32, #tpu.memory_space<vmem>>, vector<3x2xf32>
      %c0_14 = arith.constant 0 : index
      %c0_15 = arith.constant 0 : index
      %48 = vector.load %arg5[%c0_14, %c0_15] : memref<2x128xf32, #tpu.memory_space<vmem>>, vector<2x128xf32>
      %cst_16 = arith.constant dense<0.000000e+00> : vector<3x128xf32>
      %49 = tpu.matmul %47, %48, %cst_16 {dimension_numbers = #tpu.dot_dimension_numbers<[1], [0], [0], [1], [0, 0, 1, 1], [], []>} : vector<3x2xf32>, vector<2x128xf32>, vector<3x128xf32> -> vector<3x128xf32>
      %50 = arith.subf %22, %49 : vector<3x128xf32>
      %51 = arith.addf %46, %50 : vector<3x128xf32>
      %52 = vector.broadcast %44 : vector<1x128xf32> to vector<3x128xf32>
      %53 = arith.mulf %52, %34 : vector<3x128xf32>
      %54 = vector.broadcast %41 : vector<1x128xf32> to vector<3x128xf32>
      %55 = arith.mulf %54, %51 : vector<3x128xf32>
      %56 = arith.addf %53, %55 : vector<3x128xf32>
      %c0_17 = arith.constant 0 : index
      %c0_18 = arith.constant 0 : index
      %57 = vector.load %arg6[%c0_17, %c0_18] : memref<3x128xf32, #tpu.memory_space<vmem>>, vector<3x128xf32>
      tpu.vector_store %arg6[%c0_17, %c0_18], %56 {strides = array<i32>} : memref<3x128xf32, #tpu.memory_space<vmem>>, vector<3x128xf32>,
    } else {
    }
    return
  }
  func.func @transform_0(%arg0: i32, %arg1: i32) -> i32 {
    %c0_i32 = arith.constant 0 : i32
    %c0_i32_0 = arith.constant 0 : i32
    return %c0_i32 : i32
  }
  func.func @transform_1(%arg0: i32, %arg1: i32) -> (i32, i32) {
    %c0_i32 = arith.constant 0 : i32
    %c0_i32_0 = arith.constant 0 : i32
    return %c0_i32, %arg1 : i32, i32
  }
  func.func @transform_2(%arg0: i32, %arg1: i32) -> (i32, i32) {
    %c1_i32 = arith.constant 1 : i32
    %0 = arith.subi %c1_i32, %arg0 : i32
    %1 = arith.muli %arg1, %0 : i32
    %c0_i32 = arith.constant 0 : i32
    %c0_i32_0 = arith.constant 0 : i32
    return %1, %c0_i32 : i32, i32
  }
  func.func @transform_3(%arg0: i32, %arg1: i32) -> (i32, i32) {
    %0 = arith.muli %arg1, %arg0 : i32
    %c0_i32 = arith.constant 0 : i32
    %c0_i32_0 = arith.constant 0 : i32
    return %c0_i32, %0 : i32, i32
  }
  func.func @transform_4(%arg0: i32, %arg1: i32) -> (i32, i32) {
    %0 = arith.muli %arg1, %arg0 : i32
    %c0_i32 = arith.constant 0 : i32
    %c0_i32_0 = arith.constant 0 : i32
    return %c0_i32, %0 : i32, i32
  }
}

</mosaic_0001>

<bundles_post_ra>
// kernel: tpu_custom_call.1
= control target key start
LH: loop header
LB: loop body
LE: loop exit
PB: predicated region body
PF: predicated region fallthrough
CT: control target
= control target key end

     0   :  { %9 = vsyncpa [#allocation5], 0  ;;  %s1033_s0 = inlined_call_operand.vmem [shape: f32[6], index: 0, kind: input, shape index: {}]   ;;  %s1034_s1 = inlined_call_operand.vmem [shape: f32[4,128], index: 1, kind: input, shape index: {}]   ;;  %s1035_s2 = inlined_call_operand.vmem [shape: f32[128,2], index: 2, kind: input, shape index: {}]   ;;  %s1036_s3 = inlined_call_operand.vmem [shape: f32[2,128], index: 3, kind: input, shape index: {}]   ;;  %s1037_s4 = inlined_call_operand.hbm [shape: f32[3,128], index: 4, kind: output, shape index: {}]  }
   0x1   :  { %10 = vsyncpa [#allocation4], 0 }
   0x2   :  { %12 = vsyncpa [#allocation4 + $0x1], 0  ;;  %s889_s15 = smov 0   ;;  %s891_s16 = smov 0  }
   0x3   :  { %s893_s17 = smov 0  }
   0x4 LB: > { %s646_s18 = sadd.s32 4294967295, %s855_s17   ;;  %s647_s19 = sadd.s32 4294967294, %s855_s17   ;;  %s855_s17 = sphi %s893_s17, %s18_s17   ;;  %s851_s16 = sphi %s891_s16, %s1042_s16   ;;  %s847_s15 = sphi %s889_s15, %s1041_s15  }
   0x5   : > { %s30_s20 = sadd.s32 1, %s851_s16  ;;  %p648_p0 = scmp.ge.s32.totalorder %s855_s17, 1 }
   0x6   : > { %p32_p1 = scmp.ge.s32.totalorder %s30_s20, 2  ;;  %p168_p2 = scmp.lt.s32.totalorder %s855_s17, 3 }
   0x7   : > { %p911_p3 = scmp.eq.s32.totalorder %s646_s18, 0  ;;  %s181_s25 = sshll.u32 %s1033_s0, 4  ;;  %s182_s25 = int_to_ptr.vmem [resolvable:$true] %s181_s25 }
   0x8   : > { %s1044_s20 = smov (%p32_p1, %s30_s20), 0  ;;  %p917_p4 = pnand %p648_p0, %p168_p2 }
   0x9   : > { %s786_s26 = scalar_lea.vmem %s182_s25, 16  ;;  %p794_p11 = scmp.lt.s32.totalorder %s182_s25, %s182_s25 }
   0xa   : > { %p738_p5 = pneg %p917_p4  ;;  %p787_p7 = scmp.ne.s32.totalorder %s182_s25, %s786_s26 }
   0xb   : > { %p795_p12 = scmp.lt.s32.totalorder %s786_s26, %s786_s26 }
   0xc   : > { %p739_p6 = pnand %p911_p3, %p738_p5 }
   0xd   : > { %p796_p13 = por %p795_p12, %p794_p11 }
   0xe   : > { %p788_p8 = pneg %p739_p6 }
  0x10   : > { %p789_p9 = pnand %p788_p8, %p787_p7 }
  0x12   : > { %p790_p10 = pneg %p789_p9 }
  0x14   : > { %p797_p0 = pnand %p796_p13, %p790_p10 }
  0x16   : > { %800 = shalt.err (!%p797_p0)
}
  0x17   : > { %s857_s27 = smov [#allocation3]   ;;  %223 = sbr.rel (%p917_p4) target bundleno = 519 (0x207), region = 36 }
  0x18   : > { %741 = dma.vmem_to_smem (!%p739_p6), %s182_s25, 16, %s857_s27, [#allocation5]  }
  0x1c   : > { %838 = dma.done.wait (%p911_p3), [#allocation5], 16  }
  0x1d   : > { %840 = vsyncadd (%p911_p3), [#allocation5], 4294967280 }
  0x1e   : > { %229 = sfence }
  0x1f   : > { %v937_v0 = vld [vmem:[%s1034_s1 + $0x3] sm:$0x1]  ;;  %p314_p1 = scmp.eq.s32.totalorder %s847_s15, 0  ;;  %s286_s30 = sld [smem:[#allocation3]]  ;;  %vm310_vm0 = vcmask 1040384   ;;  %vm312_vm1 = vcmask 1041408  }
  0x20   : > { %782 = vlog2.f32 %v937_v0  ;;  %s656_s5 = sld [smem:[#allocation3 + $0x3]]  ;;  %vm320_vm2 = vcmask (%p314_p1), 10240   ;;  %v858_v20 = vmov (%p314_p1), 0.0  }
  0x21   : > { %s658_s6 = sld [smem:[#allocation3 + $0x4]]  ;;  %321 = vst.msk [vmem:[#allocation2] sm:$0x7] (%p314_p1), %vm320_vm2, %v858_v20 }
  0x22   : > { %s660_s7 = sld [smem:[#allocation3 + $0x5]] }
  0x23   : > { %s657_s8 = sld [smem:[#allocation3 + $0x1]] }
  0x24   : > { %s659_s9 = sld [smem:[#allocation3 + $0x2]] }
  0x25   : > { %v290_v7 = vstv %s286_s30 }
  0x26   : > { %v288_v3 = vstv %s656_s5 }
  0x27   : > { %v294_v4 = vstv %s658_s6 }
  0x28   : > { %v300_v5 = vstv %s660_s7 }
  0x29   : > { %v296_v8 = vstv %s657_s8 }
  0x2a   : > { %v302_v9 = vstv %s659_s9 }
  0x2d   : > { %v783_v1 = vpop.eup %782 }
  0x2e   : > { %v284_v2 = vmul.f32 0.6931472, %v783_v1 }
  0x30   : > { %v285_v6 = vmul.f32 0.25, %v284_v2 }
  0x32   : > { %v289_v10 = vmul.f32 %v288_v3, %v285_v6  ;;  %v295_v11 = vmul.f32 %v294_v4, %v285_v6  ;;  %v301_v12 = vmul.f32 %v300_v5, %v285_v6 }
  0x34   : > { %v291_v13 = vadd.f32 %v290_v7, %v289_v10  ;;  %v297_v14 = vadd.f32 %v296_v8, %v295_v11  ;;  %v303_v15 = vadd.f32 %v302_v9, %v301_v12 }
  0x35   : > { %319 = sbr.rel (!%p314_p1) target bundleno = 58 (0x3a), region = 44 }
  0x36   : > { %v305_v16 = vrot.slane %v297_v14, 7  ;;  %v308_v17 = vrot.slane %v303_v15, 6 }
  0x38   : > { %v311_v18 = vsel %vm310_vm0, %v291_v13, %v305_v16 }
  0x39   : > { %v942_v19 = vsel %vm312_vm1, %v311_v18, %v308_v17 }
  0x3a PF: > { %p662_p2 = scmp.ne.s32.totalorder %s847_s15, 0 }
  0x3c   : > { %324 = sbr.rel (%p662_p2) target bundleno = 294 (0x126), region = 48 }
  0x41   : > { %v341_v21 = vld [vmem:[%s1035_s2 + $0x78] sm:$0xff]  ;;  %v859_v22 = vmov 0.0   ;;  %v340_v23 = vld [vmem:[%s1035_s2 + $0x70] sm:$0xff]  ;;  %vm860_vm3 = vmmov 0   ;;  %v339_v24 = vld [vmem:[%s1035_s2 + $0x68] sm:$0xff]  ;;  %vm413_vm4 = vcmask 10240  }
  0x42   : > { %690 = vmatprep.subr.mxu0 %v859_v22  ;;  %722 = vmatprep.mubr.msk.f32.mxu0 %vm860_vm3, %v859_v22  ;;  %v338_v25 = vld [vmem:[%s1035_s2 + $0x60] sm:$0xff]  ;;  %v337_v26 = vld [vmem:[%s1035_s2 + $0x58] sm:$0xff]  ;;  %v336_v27 = vld [vmem:[%s1035_s2 + $0x50] sm:$0xff] }
  0x43   : > { %691 = vmatpush3.msra.mxu0 %v341_v21  ;;  %v335_v28 = vld [vmem:[%s1035_s2 + $0x48] sm:$0xff]  ;;  %v334_v29 = vld [vmem:[%s1035_s2 + $0x40] sm:$0xff]  ;;  %v333_v30 = vld [vmem:[%s1035_s2 + $0x38] sm:$0xff] }
  0x44   : > { %692 = vmatprep.subr.mxu0 %v859_v22  ;;  %v332_v31 = vld [vmem:[%s1035_s2 + $0x30] sm:$0xff]  ;;  %v331_v32 = vld [vmem:[%s1035_s2 + $0x28] sm:$0xff]  ;;  %v330_v33 = vld [vmem:[%s1035_s2 + $0x20] sm:$0xff] }
  0x45   : > { %693 = vmatpush3.msra.mxu0 %v340_v23  ;;  %v329_v34 = vld [vmem:[%s1035_s2 + $0x18] sm:$0xff]  ;;  %v328_v35 = vld [vmem:[%s1035_s2 + $0x10] sm:$0xff]  ;;  %v327_v36 = vld [vmem:[%s1035_s2 + $0x8] sm:$0xff] }
  0x46   : > { %694 = vmatprep.subr.mxu0 %v859_v22  ;;  %v326_v37 = vld [vmem:[%s1035_s2] sm:$0xff] }
  0x47   : > { %695 = vmatpush3.msra.mxu0 %v339_v24  ;;  %v325_v38 = vld [vmem:[#allocation2] sm:$0x7] }
  0x48   : > { %696 = vmatprep.subr.mxu0 %v859_v22 }
  0x49   : > { %697 = vmatpush3.msra.mxu0 %v338_v25 }
  0x4a   : > { %698 = vmatprep.subr.mxu0 %v859_v22 }
  0x4b   : > { %699 = vmatpush3.msra.mxu0 %v337_v26 }
  0x4c   : > { %700 = vmatprep.subr.mxu0 %v859_v22 }
  0x4d   : > { %701 = vmatpush3.msra.mxu0 %v336_v27 }
  0x4e   : > { %702 = vmatprep.subr.mxu0 %v859_v22 }
  0x4f   : > { %703 = vmatpush3.msra.mxu0 %v335_v28 }
  0x50   : > { %704 = vmatprep.subr.mxu0 %v859_v22 }
  0x51   : > { %705 = vmatpush3.msra.mxu0 %v334_v29 }
  0x52   : > { %706 = vmatprep.subr.mxu0 %v859_v22 }
  0x53   : > { %707 = vmatpush3.msra.mxu0 %v333_v30 }
  0x54   : > { %708 = vmatprep.subr.mxu0 %v859_v22 }
  0x55   : > { %709 = vmatpush3.msra.mxu0 %v332_v31 }
  0x56   : > { %710 = vmatprep.subr.mxu0 %v859_v22 }
  0x57   : > { %711 = vmatpush3.msra.mxu0 %v331_v32 }
  0x58   : > { %712 = vmatprep.subr.mxu0 %v859_v22 }
  0x59   : > { %713 = vmatpush3.msra.mxu0 %v330_v33 }
  0x5a   : > { %714 = vmatprep.subr.mxu0 %v859_v22 }
  0x5b   : > { %715 = vmatpush3.msra.mxu0 %v329_v34 }
  0x5c   : > { %716 = vmatprep.subr.mxu0 %v859_v22 }
  0x5d   : > { %717 = vmatpush3.msra.mxu0 %v328_v35 }
  0x5e   : > { %718 = vmatprep.subr.mxu0 %v859_v22 }
  0x5f   : > { %719 = vmatpush3.msra.mxu0 %v327_v36 }
  0x60   : > { %720 = vmatprep.subr.mxu0 %v859_v22 }
  0x61   : > { %721 = vmatpush3.msra.mxu0 %v326_v37 }
  0x62   : > { %723 = vmatmul.mubr.f32.vlgmr.msra.gmra.mxu0 %v942_v19 }
 0x122   : > { %v408_v39 = vpop.f32.mrf.mxu0 }
 0x123   : > { %v412_v40 = vadd.f32 %v408_v39, %v325_v38 }
 0x124   : > { %v724_v41 = vpop.f32.mrf.mxu0 }
 0x125   : > { %414 = vst.msk [vmem:[#allocation2] sm:$0x7] %vm413_vm4, %v412_v40 }
 0x126 PF: > { %p663_p3 = scmp.ne.s32.totalorder %s847_s15, 1 }
 0x128   : > { %418 = sbr.rel (%p663_p3) target bundleno = 506 (0x1fa), region = 52 }
 0x12d   : > { %v433_v42 = vld [vmem:[%s1036_s3] sm:$0x3]  ;;  %v861_v44 = vmov 0.0   ;;  %vm862_vm5 = vmmov 0   ;;  %vm434_vm6 = vcmask 15360   ;;  %v420_v45 = vmul.f32 %v937_v0, %v937_v0 }
 0x12e   : > { %v432_v43 = vld [vmem:[#allocation2] sm:$0x7]  ;;  %725 = vmatprep.subr.mxu0 %v861_v44  ;;  %727 = vmatprep.mubr.msk.f32.mxu0 %vm862_vm5, %v861_v44  ;;  %v427_v47 = vlaneseq  ;;  %v423_v52 = vmul.f32 0.5, %v937_v0 }
 0x12f   : > { %726 = vmatpush3.msk.msra.mxu0 %vm312_vm1, %v433_v42  ;;  %v421_v46 = vadd.f32 0.25, %v420_v45  ;;  %v419_v55 = vld [vmem:[%s1034_s1] sm:$0x7] }
 0x130   : > { %728 = vmatmul.mubr.msk.f32.vlgmr.msra.gmra.mxu0 %vm434_vm6, %v432_v43  ;;  %v428_v48 = vshrl.u32 %v427_v47, 7 }
 0x131   : > { %784 = vrsqrt.f32 %v421_v46 }
 0x132   : > { %v429_v51 = vsub.s32 0, %v428_v48 }
 0x13e   : > { %v785_v49 = vpop.eup %784 }
 0x13f   : > { %v425_v50 = vmul.f32 %v785_v49, %v785_v49  ;;  %v430_v54 = vrot.slane %v785_v49, %v429_v51  ;;  %v424_v56 = vmul.f32 %v785_v49, %v423_v52 }
 0x141   : > { %v426_v53 = vmul.f32 0.25, %v425_v50  ;;  %v431_v57 = vmul.f32 %v430_v54, %v419_v55  ;;  %v521_v61 = vrot.slane %v424_v56, %v429_v51 }
 0x143   : > { %v516_v58 = vrot.slane %v426_v53, %v429_v51 }
 0x145   : > { %v517_v1 = vmul.f32 %v516_v58, %v419_v55 }
 0x1f0   : > { %v507_v59 = vpop.f32.mrf.mxu0 }
 0x1f1   : > { %v511_v60 = vsub.f32 %v942_v19, %v507_v59 }
 0x1f2   : > { %v729_v62 = vpop.f32.mrf.mxu0 }
 0x1f3   : > { %v512_v63 = vadd.f32 %v511_v60, %v431_v57 }
 0x1f5   : > { %v522_v2 = vmul.f32 %v521_v61, %v512_v63 }
 0x1f7   : > { %v523_v3 = vadd.f32 %v522_v2, %v517_v1 }
 0x1f9   : > { %524 = vst [vmem:[#allocation6] sm:$0x7] %v523_v3 }
 0x1fa PF: > { %p1010_p4 = scmp.eq.s32.totalorder %s646_s18, 1  ;;  %s863_s6 = smov [#allocation6]  }
 0x1fb   : > { %s540_s7 = sshll.u32 %s863_s6, 4  ;;  %s541_s7 = int_to_ptr.vmem [resolvable:$true] %s540_s7 }
 0x1fc   : > { %s801_s8 = scalar_lea.vmem %s541_s7, 64  ;;  %s807_s9 = scalar_lea.vmem %s541_s7, 128 }
 0x1fd   : > { %p802_p5 = scmp.ne.s32.totalorder %s541_s7, %s801_s8  ;;  %p808_p8 = scmp.lt.s32.totalorder %s541_s7, %s541_s7 }
 0x1fe   : > { %p809_p9 = scmp.lt.s32.totalorder %s807_s9, %s801_s8 }
 0x1ff   : > { %p803_p6 = pnand %p802_p5, %p1010_p4 }
 0x200   : > { %p810_p10 = por %p809_p9, %p808_p8 }
 0x201   : > { %p804_p7 = pneg %p803_p6 }
 0x203   : > { %p811_p11 = pnand %p810_p10, %p804_p7 }
 0x205   : > { %814 = shalt.err (!%p811_p11)
}
 0x206   : > { %735 = dma.vmem_to_hbm [thread:$0]  (%p1010_p4), %s541_s7, 64, %s1037_s4, [#allocation4]  }
 0x207 PF: > { %p749_p12 = scmp.ge.s32.totalorder %s855_s17, 2  ;;  %p750_p13 = scmp.eq.s32.totalorder %s647_s19, 1 }
 0x209   : > { %p743_p0 = pnand %p750_p13, %p749_p12 }
 0x20b   : > { %p744_p1 = pneg %p743_p0 }
 0x20d   : > { %842 = dma.done.wait (%p744_p1), [#allocation4], 64  }
 0x20e   : > { %844 = vsyncadd (%p744_p1), [#allocation4], 4294967232  ;;  %s18_s17 = sadd.s32 1, %s855_s17   ;;  %s1041_s15 = smov %s851_s16 }
 0x20f   : > { %p15_p2 = scmp.ge.s32.totalorder %s18_s17, 4   ;;  %s1042_s16 = smov %s1044_s20 }
 0x211   :  { %17 = sbr.rel (!%p15_p2) target bundleno = 4 (0x4), region = 94 }
 0x216   :  { %558 = vsyncpa [#allocation4], 1 }
 0x217   :  { %560 = vsyncpa [#allocation4 + $0x1], 1 }
 0x218   :  { %561 = vsyncpa [#allocation5], 1 }
 0x219   :  { %563 = vsyncpa [#allocation5 + $0x1], 1 }

</bundles_post_ra>
